<compile_context>
chip_gen: v7x
topology: tpu7x:2x2x1
jax: 0.10.0
libtpu: 0.0.40
codegen_flags: <defaults>
</compile_context>

<pallas_src>
import functools
import unicodedata

import numpy as np
import jax
import jax.numpy as jnp
from jax.experimental import pallas as pl
from jax.experimental.pallas import tpu as pltpu


# ---------------------------------------------------------------------------
# Host-side tables (built once, baked into the kernel as constants).
# ---------------------------------------------------------------------------
def _build_tables():
    """Case-folded (lo, hi, base) codepoint ranges + un-foldable extras.

    A precomposed Latin-1 letter `cp` NFKD-strips to `base`.  For almost all
    of them the lowercase form is `cp | 0x20` and strips to `base | 0x20`, so
    the kernel clears bit 5 once and matches half as many ranges.  The few
    that don't fold (ÿ -> y; its "uppercase" slot 0xDF is ß) stay un-folded,
    and combining marks U+0300..U+036F map to 0 (dropped by the host join).
    """
    pairs = {}
    for cp in range(0xC0, 0x100):
        ch = chr(cp)
        nfkd = unicodedata.normalize("NFKD", ch)
        stripped = "".join(c for c in nfkd if not unicodedata.combining(c))
        if stripped != ch and len(stripped) == 1:
            pairs[cp] = ord(stripped)

    folded, extra = {}, {}
    for cp, base in pairs.items():
        u, b = cp & ~0x20, base & ~0x20
        partner = u | 0x20
        ok = ((cp & 0x20) == (base & 0x20)
              and pairs.get(u) == b
              and (partner not in pairs or pairs[partner] == (b | 0x20)))
        if ok:
            folded[u] = b
        else:
            extra[cp] = base

    def to_ranges(mapping):
        rng = []
        for cp in sorted(mapping):
            base = mapping[cp]
            if rng and rng[-1][1] == cp - 1 and rng[-1][2] == base:
                rng[-1] = (rng[-1][0], cp, base)
            else:
                rng.append((cp, cp, base))
        return tuple(tuple(r) for r in rng)

    # Combining-mark block is applied on the raw codepoints (not case-folded).
    extra_ranges = to_ranges(extra) + ((0x300, 0x36F, 0),)
    return to_ranges(folded), extra_ranges


_FOLDED_RANGES, _EXTRA_RANGES = _build_tables()   # 8 folded + 2 extra ranges


def _round_up(x, m):
    return ((x + m - 1) // m) * m


# ---------------------------------------------------------------------------
# Pallas kernel
# ---------------------------------------------------------------------------
def _range_delta(vals, lo, hi, base):
    """Delta that maps vals in [lo, hi] to the remapped base; 0 elsewhere."""
    span = hi - lo
    if span == 0:
        # Single codepoint: delta is a compile-time constant (cmp + select).
        return jnp.where(vals == lo, jnp.int32(base - lo), jnp.int32(0))
    # Unsigned range check: one compare instead of (>= lo) & (<= hi); `t` is
    # reused for the delta so no second subtraction of `vals`.
    t = vals - lo
    in_rng = t.astype(jnp.uint32) <= jnp.uint32(span)
    return jnp.where(in_rng, (base - lo) - t, jnp.int32(0))


def _diacritic_kernel(mask_ref, tok_ref, out_ref, *, folded_ranges, extra_ranges):
    toks = tok_ref[...]                       # (BLOCK_N, L) int32 codepoints

    # Fold the Latin-1 case bit once so upper/lowercase letters share ranges.
    case_bit = toks & 0x20
    u = toks - case_bit                       # == toks & ~0x20

    # Two running accumulators (round-robin) instead of materializing one
    # full-block temporary per range and tree-summing them.
    acc = [None, None]

    def _add(i, d):
        j = i & 1
        acc[j] = d if acc[j] is None else acc[j] + d
        return i + 1

    i = 0
    for lo, hi, base in folded_ranges:        # precomposed Latin-1 letters
        i = _add(i, _range_delta(u, lo, hi, base))
    for lo, hi, base in extra_ranges:         # ÿ -> y, combining marks -> 0
        i = _add(i, _range_delta(toks, lo, hi, base))
    delta = acc[0] if acc[1] is None else acc[0] + acc[1]

    # Per-row Bernoulli decision (1 = strip).  (BLOCK_N, 1) int32 broadcasts
    # over the lane axis; multiply-add avoids a full-block boolean temporary.
    out_ref[...] = toks + delta * mask_ref[...]


# ---------------------------------------------------------------------------
# pallas_call wrapper (jit'ed; prob / tile size static)
# ---------------------------------------------------------------------------
@functools.partial(jax.jit, static_argnames=("prob", "block_n"))
def diacritic_augment(tokens, key, *, prob=0.3, block_n=2048):
    """tokens: int32 [N, L] codepoints (N % block_n == 0, L % 128 == 0)."""
    n, l = tokens.shape
    assert n % block_n == 0 and l % 128 == 0

    # Per-token Bernoulli(prob): mirrors `random.random() < self.prob`.
    u = jax.random.uniform(key, (n, 1))
    remove = (u < prob).astype(jnp.int32)

    kernel = functools.partial(
        _diacritic_kernel,
        folded_ranges=_FOLDED_RANGES,
        extra_ranges=_EXTRA_RANGES,
    )
    return pl.pallas_call(
        kernel,
        out_shape=jax.ShapeDtypeStruct((n, l), jnp.int32),
        grid=(n // block_n,),
        in_specs=[
            pl.BlockSpec((block_n, 1), lambda i: (i, 0)),   # per-row strip mask
            pl.BlockSpec((block_n, l), lambda i: (i, 0)),   # token codepoints
        ],
        out_specs=pl.BlockSpec((block_n, l), lambda i: (i, 0)),
        compiler_params=pltpu.CompilerParams(
            dimension_semantics=("parallel",),
            vmem_limit_bytes=32 * 1024 * 1024,
        ),
    )(remove, tokens)


def _pick_block_rows(n_tok, l, block_n):
    """Row-tile size: large enough to amortize per-grid-step overhead, small
    enough that in+out double-buffered VMEM stays <= ~16 MiB (v7x-safe), and
    split so there are >= 2 grid steps whenever possible (v7x has 2 TCs)."""
    blk = min(block_n, _round_up(n_tok, 8))
    # (in + out) tiles x 2 pipeline buffers x blk x l x 4 B  <=  16 MiB.
    vmem_rows = max(8, ((16 * 1024 * 1024) // (16 * l)) // 8 * 8)
    blk = min(blk, vmem_rows)
    if n_tok > 8:  # allow at least 2 grid steps so both v7x TensorCores work
        blk = min(blk, _round_up(-(-n_tok // 2), 8))
    return max(blk, 8)


# ---------------------------------------------------------------------------
# Forward pass mirroring DiacreticAugmentation.forward on a
# {'tokens': [...], 'ner_tags': [...]} sample.
# ---------------------------------------------------------------------------
def forward(sample, key, *, prob=0.3, max_len=128, block_n=2048):
    tokens = sample.get("tokens", [])
    ner_tags = sample.get("ner_tags", [])

    n_tok = max(len(tokens), 1)
    l = _round_up(max_len, 128)
    blk = _pick_block_rows(n_tok, l, block_n)
    n = _round_up(n_tok, blk)

    # TODO(synk): host-side encode/decode of variable-length strings has no
    # tensor equivalent; tokens longer than l characters are truncated.
    arr = np.zeros((n, l), np.int32)
    for i, t in enumerate(tokens):
        cps = [ord(c) for c in t][:l]
        arr[i, : len(cps)] = cps

    out = diacritic_augment(jnp.asarray(arr), key, prob=prob, block_n=blk)
    out = np.asarray(jax.block_until_ready(out))

    new_tokens = [
        "".join(chr(int(c)) for c in out[i] if int(c) != 0)
        for i in range(len(tokens))
    ]
    return {"tokens": new_tokens, "ner_tags": ner_tags}


def _ref_remove_diacritics(text):
    nfkd = unicodedata.normalize("NFKD", text)
    return "".join(c for c in nfkd if not unicodedata.combining(c))


if __name__ == "__main__":
    key = jax.random.PRNGKey(0)

    sample = {
        "tokens": ["café", "naïve", "résumé", "jalapeño", "über",
                   "crème", "señor", "cafe\u0301", "hello", "world"],
        "ner_tags": ["O", "O", "B-MISC", "O", "O", "O", "O", "O", "O", "O"],
    }

    # prob=1.0: every token stripped -> must match the unicodedata reference.
    all_on = forward(sample, key, prob=1.0, max_len=128)
    assert all_on["tokens"] == [_ref_remove_diacritics(t) for t in sample["tokens"]]

    # prob=0.0: nothing changes.
    all_off = forward(sample, key, prob=0.0, max_len=128)
    assert all_off["tokens"] == sample["tokens"]

    # prob=0.3: stochastic path (deterministic given PRNGKey(0)).
    result = forward(sample, key, prob=0.3, max_len=128)
    assert len(result["tokens"]) == len(sample["tokens"])
    assert result["ner_tags"] == sample["ner_tags"]
    for orig, new in zip(sample["tokens"], result["tokens"]):
        assert new in (orig, _ref_remove_diacritics(orig))

    print("KERNEL_OK")
</pallas_src>

<mosaic_0001>
module attributes {stable_mosaic.version = 11 : i64} {
  func.func @_diacritic_kernel(%arg0: i32, %arg1: memref<8x1xi32, #tpu.memory_space<vmem>>, %arg2: memref<8x128xi32, #tpu.memory_space<vmem>>, %arg3: memref<8x128xi32, #tpu.memory_space<vmem>>) attributes {dimension_semantics = [#tpu.dimension_semantics<parallel>], iteration_bounds = array<i64: 2>, scalar_prefetch = 0 : i64, scratch_operands = 0 : i64, tpu.core_type = #tpu.core_type<tc>, window_params = [{transform_indices = @transform_0, window_bounds = array<i64: 8, 1>}, {transform_indices = @transform_1, window_bounds = array<i64: 8, 128>}, {transform_indices = @transform_2, window_bounds = array<i64: 8, 128>}]} {
    %c0 = arith.constant 0 : index
    %c0_0 = arith.constant 0 : index
    %0 = vector.load %arg2[%c0, %c0_0] : memref<8x128xi32, #tpu.memory_space<vmem>>, vector<8x128xi32>
    %c32_i32 = arith.constant 32 : i32
    %1 = vector.broadcast %c32_i32 : i32 to vector<8x128xi32>
    %2 = arith.andi %0, %1 : vector<8x128xi32>
    %3 = arith.subi %0, %2 : vector<8x128xi32>
    %c192_i32 = arith.constant 192 : i32
    %4 = vector.broadcast %c192_i32 : i32 to vector<8x128xi32>
    %5 = arith.subi %3, %4 : vector<8x128xi32>
    %c5_i32 = arith.constant 5 : i32
    %6 = vector.broadcast %c5_i32 : i32 to vector<8x128xi32>
    %7 = arith.cmpi ule, %5, %6 : vector<8x128xi32>
    %c-127_i32 = arith.constant -127 : i32
    %8 = vector.broadcast %c-127_i32 : i32 to vector<8x128xi32>
    %9 = arith.subi %8, %5 : vector<8x128xi32>
    %c0_i32 = arith.constant 0 : i32
    %10 = vector.broadcast %c0_i32 : i32 to vector<8x128xi32>
    %11 = arith.select %7, %9, %10 : vector<8x128xi1>, vector<8x128xi32>
    %c199_i32 = arith.constant 199 : i32
    %12 = vector.broadcast %c199_i32 : i32 to vector<8x128xi32>
    %13 = arith.cmpi eq, %3, %12 : vector<8x128xi32>
    %c-132_i32 = arith.constant -132 : i32
    %c0_i32_1 = arith.constant 0 : i32
    %14 = vector.broadcast %c-132_i32 : i32 to vector<8x128xi32>
    %15 = vector.broadcast %c0_i32_1 : i32 to vector<8x128xi32>
    %16 = arith.select %13, %14, %15 : vector<8x128xi1>, vector<8x128xi32>
    %c200_i32 = arith.constant 200 : i32
    %17 = vector.broadcast %c200_i32 : i32 to vector<8x128xi32>
    %18 = arith.subi %3, %17 : vector<8x128xi32>
    %c3_i32 = arith.constant 3 : i32
    %19 = vector.broadcast %c3_i32 : i32 to vector<8x128xi32>
    %20 = arith.cmpi ule, %18, %19 : vector<8x128xi32>
    %c-131_i32 = arith.constant -131 : i32
    %21 = vector.broadcast %c-131_i32 : i32 to vector<8x128xi32>
    %22 = arith.subi %21, %18 : vector<8x128xi32>
    %c0_i32_2 = arith.constant 0 : i32
    %23 = vector.broadcast %c0_i32_2 : i32 to vector<8x128xi32>
    %24 = arith.select %20, %22, %23 : vector<8x128xi1>, vector<8x128xi32>
    %25 = arith.addi %11, %24 : vector<8x128xi32>
    %c204_i32 = arith.constant 204 : i32
    %26 = vector.broadcast %c204_i32 : i32 to vector<8x128xi32>
    %27 = arith.subi %3, %26 : vector<8x128xi32>
    %c3_i32_3 = arith.constant 3 : i32
    %28 = vector.broadcast %c3_i32_3 : i32 to vector<8x128xi32>
    %29 = arith.cmpi ule, %27, %28 : vector<8x128xi32>
    %c-131_i32_4 = arith.constant -131 : i32
    %30 = vector.broadcast %c-131_i32_4 : i32 to vector<8x128xi32>
    %31 = arith.subi %30, %27 : vector<8x128xi32>
    %c0_i32_5 = arith.constant 0 : i32
    %32 = vector.broadcast %c0_i32_5 : i32 to vector<8x128xi32>
    %33 = arith.select %29, %31, %32 : vector<8x128xi1>, vector<8x128xi32>
    %34 = arith.addi %16, %33 : vector<8x128xi32>
    %c209_i32 = arith.constant 209 : i32
    %35 = vector.broadcast %c209_i32 : i32 to vector<8x128xi32>
    %36 = arith.cmpi eq, %3, %35 : vector<8x128xi32>
    %c-131_i32_6 = arith.constant -131 : i32
    %c0_i32_7 = arith.constant 0 : i32
    %37 = vector.broadcast %c-131_i32_6 : i32 to vector<8x128xi32>
    %38 = vector.broadcast %c0_i32_7 : i32 to vector<8x128xi32>
    %39 = arith.select %36, %37, %38 : vector<8x128xi1>, vector<8x128xi32>
    %40 = arith.addi %25, %39 : vector<8x128xi32>
    %c210_i32 = arith.constant 210 : i32
    %41 = vector.broadcast %c210_i32 : i32 to vector<8x128xi32>
    %42 = arith.subi %3, %41 : vector<8x128xi32>
    %c4_i32 = arith.constant 4 : i32
    %43 = vector.broadcast %c4_i32 : i32 to vector<8x128xi32>
    %44 = arith.cmpi ule, %42, %43 : vector<8x128xi32>
    %c-131_i32_8 = arith.constant -131 : i32
    %45 = vector.broadcast %c-131_i32_8 : i32 to vector<8x128xi32>
    %46 = arith.subi %45, %42 : vector<8x128xi32>
    %c0_i32_9 = arith.constant 0 : i32
    %47 = vector.broadcast %c0_i32_9 : i32 to vector<8x128xi32>
    %48 = arith.select %44, %46, %47 : vector<8x128xi1>, vector<8x128xi32>
    %49 = arith.addi %34, %48 : vector<8x128xi32>
    %c217_i32 = arith.constant 217 : i32
    %50 = vector.broadcast %c217_i32 : i32 to vector<8x128xi32>
    %51 = arith.subi %3, %50 : vector<8x128xi32>
    %c3_i32_10 = arith.constant 3 : i32
    %52 = vector.broadcast %c3_i32_10 : i32 to vector<8x128xi32>
    %53 = arith.cmpi ule, %51, %52 : vector<8x128xi32>
    %c-132_i32_11 = arith.constant -132 : i32
    %54 = vector.broadcast %c-132_i32_11 : i32 to vector<8x128xi32>
    %55 = arith.subi %54, %51 : vector<8x128xi32>
    %c0_i32_12 = arith.constant 0 : i32
    %56 = vector.broadcast %c0_i32_12 : i32 to vector<8x128xi32>
    %57 = arith.select %53, %55, %56 : vector<8x128xi1>, vector<8x128xi32>
    %58 = arith.addi %40, %57 : vector<8x128xi32>
    %c221_i32 = arith.constant 221 : i32
    %59 = vector.broadcast %c221_i32 : i32 to vector<8x128xi32>
    %60 = arith.cmpi eq, %3, %59 : vector<8x128xi32>
    %c-132_i32_13 = arith.constant -132 : i32
    %c0_i32_14 = arith.constant 0 : i32
    %61 = vector.broadcast %c-132_i32_13 : i32 to vector<8x128xi32>
    %62 = vector.broadcast %c0_i32_14 : i32 to vector<8x128xi32>
    %63 = arith.select %60, %61, %62 : vector<8x128xi1>, vector<8x128xi32>
    %64 = arith.addi %49, %63 : vector<8x128xi32>
    %c255_i32 = arith.constant 255 : i32
    %65 = vector.broadcast %c255_i32 : i32 to vector<8x128xi32>
    %66 = arith.cmpi eq, %0, %65 : vector<8x128xi32>
    %c-134_i32 = arith.constant -134 : i32
    %c0_i32_15 = arith.constant 0 : i32
    %67 = vector.broadcast %c-134_i32 : i32 to vector<8x128xi32>
    %68 = vector.broadcast %c0_i32_15 : i32 to vector<8x128xi32>
    %69 = arith.select %66, %67, %68 : vector<8x128xi1>, vector<8x128xi32>
    %70 = arith.addi %58, %69 : vector<8x128xi32>
    %c768_i32 = arith.constant 768 : i32
    %71 = vector.broadcast %c768_i32 : i32 to vector<8x128xi32>
    %72 = arith.subi %0, %71 : vector<8x128xi32>
    %c111_i32 = arith.constant 111 : i32
    %73 = vector.broadcast %c111_i32 : i32 to vector<8x128xi32>
    %74 = arith.cmpi ule, %72, %73 : vector<8x128xi32>
    %c-768_i32 = arith.constant -768 : i32
    %75 = vector.broadcast %c-768_i32 : i32 to vector<8x128xi32>
    %76 = arith.subi %75, %72 : vector<8x128xi32>
    %c0_i32_16 = arith.constant 0 : i32
    %77 = vector.broadcast %c0_i32_16 : i32 to vector<8x128xi32>
    %78 = arith.select %74, %76, %77 : vector<8x128xi1>, vector<8x128xi32>
    %79 = arith.addi %64, %78 : vector<8x128xi32>
    %80 = arith.addi %70, %79 : vector<8x128xi32>
    %c0_17 = arith.constant 0 : index
    %c0_18 = arith.constant 0 : index
    %81 = vector.load %arg1[%c0_17, %c0_18] : memref<8x1xi32, #tpu.memory_space<vmem>>, vector<8x1xi32>
    %82 = vector.broadcast %81 : vector<8x1xi32> to vector<8x128xi32>
    %83 = arith.muli %80, %82 : vector<8x128xi32>
    %84 = arith.addi %0, %83 : vector<8x128xi32>
    %c0_19 = arith.constant 0 : index
    %c0_20 = arith.constant 0 : index
    %85 = vector.load %arg3[%c0_19, %c0_20] : memref<8x128xi32, #tpu.memory_space<vmem>>, vector<8x128xi32>
    tpu.vector_store %arg3[%c0_19, %c0_20], %84 {strides = array<i32>} : memref<8x128xi32, #tpu.memory_space<vmem>>, vector<8x128xi32>,
    return
  }
  func.func @transform_0(%arg0: i32) -> (i32, i32) {
    %c0_i32 = arith.constant 0 : i32
    %c0_i32_0 = arith.constant 0 : i32
    return %arg0, %c0_i32 : i32, i32
  }
  func.func @transform_1(%arg0: i32) -> (i32, i32) {
    %c0_i32 = arith.constant 0 : i32
    %c0_i32_0 = arith.constant 0 : i32
    return %arg0, %c0_i32 : i32, i32
  }
  func.func @transform_2(%arg0: i32) -> (i32, i32) {
    %c0_i32 = arith.constant 0 : i32
    %c0_i32_0 = arith.constant 0 : i32
    return %arg0, %c0_i32 : i32, i32
  }
}

</mosaic_0001>

<bundles_post_ra>
// kernel: diacritic_augment.1
= control target key start
LH: loop header
LB: loop body
LE: loop exit
PB: predicated region body
PF: predicated region fallthrough
CT: control target
= control target key end

     0   :  { %7 = vsyncpa [#allocation3], 0  ;;  %s534_s0 = inlined_call_operand.vmem [shape: s32[16,1], index: 0, kind: input, shape index: {}]   ;;  %s535_s1 = inlined_call_operand.vmem [shape: s32[16,128], index: 1, kind: input, shape index: {}]   ;;  %s536_s2 = inlined_call_operand.hbm [shape: s32[16,128], index: 2, kind: output, shape index: {}]  }
   0x1   :  { %9 = vsyncpa [#allocation3 + $0x1], 0  ;;  %s431_s9 = smov 0   ;;  %s433_s10 = smov 0  }
   0x2   :  { %s435_s11 = smov 0   ;;  %s437_s12 = smov 0  }
   0x3 LB: > { %s452_s13 = sadd.s32 4294967295, %s412_s12   ;;  %s292_s14 = sadd.s32 4294967294, %s412_s12   ;;  %s412_s12 = sphi %s437_s12, %s542_s12   ;;  %s408_s11 = sphi %s435_s11, %s541_s11   ;;  %s404_s10 = sphi %s433_s10, %s540_s10   ;;  %s400_s9 = sphi %s431_s9, %s539_s9  }
   0x4   : > { %s456_s15 = sadd.s32 1, %s412_s12   ;;  %s74_s16 = sadd.s32 1, %s408_s11 }
   0x5   : > { %s71_s17 = ssub.s32 %s412_s12, %s456_s15  ;;  %p84_p0 = scmp.ne.s32.totalorder %s408_s11, %s404_s10 }
   0x6   : > { %p72_p1 = scmp.eq.s32.totalorder %s71_s17, 0  ;;  %p85_p2 = scmp.eq.s32.totalorder %s452_s13, 1 }
   0x7   : > { %p90_p3 = scmp.ne.s32.totalorder %s404_s10, %s400_s9  ;;  %p91_p4 = scmp.eq.s32.totalorder %s292_s14, 1 }
   0x8   : > { %s467_s18 = scalar_select %p72_p1, %s408_s11, %s74_s16  }
   0x9   : > { %p469_p5 = por %p85_p2, %p84_p0  ;;  %p473_p6 = por %p91_p4, %p90_p3 }
   0xa   : > { %p295_p7 = scmp.ge.s32.totalorder %s412_s12, 1  ;;  %p123_p8 = scmp.lt.s32.totalorder %s412_s12, 3 }
   0xc   : > { %p124_p9 = pnand %p295_p7, %p123_p8 }
   0xd   : > { %p148_p10 = scmp.lt.s32.totalorder (!%p124_p9), %s452_s13, 1  ;;  %v414_v0 = vmov (!%p124_p9), 0   ;;  %s145_s29 = sand.u32 (!%p124_p9), 1, %s404_s10  }
   0xe   : > { %127 = sbr.rel (%p124_p9) target bundleno = 173 (0xad), region = 28  ;;  %349 = vset.pattern.permute.xlu0 (!%p124_p9), %v414_v0  ;;  %s296_s30 = sshll.u32 (!%p124_p9), %s145_s29, 3 }
   0xf   : > { %s306_s3 = sshll.u32 (!%p124_p9), %s452_s13, 7  ;;  %s147_s4 = scalar_lea.vmem (!%p124_p9), [#allocation2], %s296_s30 }
  0x10   : > { %s221_s5 = sshll.u32 (!%p124_p9), %s147_s4, 4  ;;  %s492_s8 = scalar_lea.hbm (!%p124_p9), %s536_s2, %s306_s3  ;;  %s494_s5 = int_to_ptr.vmem [resolvable:$true] %s221_s5 }
  0x11   : > { %s208_s14 = scalar_lea.sflag (!%p124_p9), [#allocation3], %s145_s29  ;;  %s350_s16 = scalar_lea.vmem (!%p124_p9), %s494_s5, 128 }
  0x12   : > { %p351_p11 = scmp.ne.s32.totalorder (!%p124_p9), %s494_s5, %s350_s16 }
  0x14   : > { %p352_p12 = pnand (!%p124_p9), %p351_p11, %p469_p5 }
  0x15   : > { %s149_s21 = scalar_select %p148_p10, %s452_s13, 1 }
  0x16   : > { %p353_p13 = pneg %p352_p12  ;;  %s415_s13 = smov [#allocation2]  }
  0x17   : > { %s297_s22 = sshll.u32 %s149_s21, 3  ;;  %s354_s17 = sshll.u32 %s415_s13, 4  ;;  %s355_s17 = int_to_ptr.vmem [resolvable:$false] %s354_s17 }
  0x18   : > { %s151_s25 = scalar_lea.vmem %s534_s0, %s297_s22  ;;  %s155_s28 = scalar_lea.vmem %s535_s1, %s297_s22 }
  0x19   : > { %v156_v1 = vld [vmem:[%s155_s28] sm:$0xff]  ;;  %s356_s21 = scalar_lea.vmem %s355_s17, 256  ;;  %p357_p0 = scmp.lt.s32.totalorder %s494_s5, %s355_s17 }
  0x1a   : > { %v200_v2 = vld [vmem:[%s151_s25] sm:$0xff]  ;;  %v157_v3 = vand.u32 32, %v156_v1  ;;  %vm191_vm0 = vcmp.eq.s32.totalorder %v156_v1, 255  ;;  %v304_v4 = vadd.s32 4294966528, %v156_v1  ;;  %p358_p1 = scmp.lt.s32.totalorder %s356_s21, %s350_s16 }
  0x1b   : > { %202 = vperm.xlu0 %349, %v200_v2   ;;  %v192_v5 = vsel %vm191_vm0, 4294967162, %v414_v0 }
  0x1c   : > { %v158_v6 = vsub.s32 %v156_v1, %v157_v3  ;;  %v196_v7 = vsub.s32 4294966528, %v304_v4  ;;  %vm195_vm9 = vcmp.le.u32.totalorder %v304_v4, 111  ;;  %p359_p2 = por %p358_p1, %p357_p0 }
  0x1e   : > { %v299_v8 = vadd.s32 4294967104, %v158_v6  ;;  %vm163_vm1 = vcmp.eq.s32.totalorder %v158_v6, 199  ;;  %v300_v9 = vadd.s32 4294967096, %v158_v6  ;;  %v301_v10 = vadd.s32 4294967092, %v158_v6  ;;  %p360_p3 = pnand %p359_p2, %p353_p13 }
  0x1f   : > { %v164_v11 = vsel %vm163_vm1, 4294967164, %v414_v0  ;;  %vm175_vm2 = vcmp.eq.s32.totalorder %v158_v6, 209  ;;  %v302_v12 = vadd.s32 4294967086, %v158_v6  ;;  %v303_v13 = vadd.s32 4294967079, %v158_v6 }
  0x20   : > { %vm160_vm3 = vcmp.le.u32.totalorder %v299_v8, 5  ;;  %v161_v14 = vsub.s32 4294967169, %v299_v8  ;;  %vm166_vm4 = vcmp.le.u32.totalorder %v300_v9, 3  ;;  %v167_v15 = vsub.s32 4294967165, %v300_v9 }
  0x21   : > { %vm171_vm5 = vcmp.le.u32.totalorder %v301_v10, 3  ;;  %v172_v16 = vsub.s32 4294967165, %v301_v10  ;;  %v176_v17 = vsel %vm175_vm2, 4294967165, %v414_v0  ;;  %vm179_vm6 = vcmp.le.u32.totalorder %v302_v12, 4 }
  0x22   : > { %v162_v18 = vsel %vm160_vm3, %v161_v14, 0  ;;  %v168_v19 = vsel %vm166_vm4, %v167_v15, 0  ;;  %v180_v20 = vsub.s32 4294967165, %v302_v12  ;;  %vm184_vm7 = vcmp.le.u32.totalorder %v303_v13, 3 }
  0x23   : > { %v169_v21 = vadd.s32 %v168_v19, %v162_v18  ;;  %v173_v22 = vsel %vm171_vm5, %v172_v16, 0  ;;  %v185_v23 = vsub.s32 4294967164, %v303_v13  ;;  %vm188_vm8 = vcmp.eq.s32.totalorder %v158_v6, 221 }
  0x24   : > { %v174_v24 = vadd.s32 %v173_v22, %v164_v11  ;;  %v181_v25 = vsel %vm179_vm6, %v180_v20, 0  ;;  %v189_v26 = vsel %vm188_vm8, 4294967164, %v414_v0  ;;  %v197_v31 = vsel %vm195_vm9, %v196_v7, 0 }
  0x25   : > { %v177_v27 = vadd.s32 %v176_v17, %v169_v21  ;;  %v186_v28 = vsel %vm184_vm7, %v185_v23, 0 }
  0x26   : > { %v182_v29 = vadd.s32 %v181_v25, %v174_v24 }
  0x27   : > { %v187_v30 = vadd.s32 %v186_v28, %v177_v27 }
  0x28   : > { %v190_v32 = vadd.s32 %v189_v26, %v182_v29 }
  0x29   : > { %v193_v33 = vadd.s32 %v192_v5, %v187_v30 }
  0x2a   : > { %v198_v34 = vadd.s32 %v197_v31, %v190_v32 }
  0x2c   : > { %v199_v35 = vadd.s32 %v198_v34, %v193_v33 }
  0x9a   : > { %v203_v36 = vpop.permute.xlu0 %202 }
  0x9b   : > { %v204_v37 = vmul.u32 %v203_v36, %v199_v35 }
  0x9d   : > { %v205_v38 = vadd.s32 %v204_v37, %v156_v1 }
  0x9f   : > { %206 = vst [vmem:[%s147_s4] sm:$0xff] %v205_v38 }
  0xa0   : > { %363 = shalt.err (!%p360_p3)
}
  0xa1   : > { %s364_s22 = scalar_lea.hbm %s492_s8, 128  ;;  %s368_s25 = scalar_lea.hbm %s536_s2, 256 }
  0xa2   : > { %p365_p4 = scmp.ne.s32.totalorder %s492_s8, %s364_s22  ;;  %p369_p9 = scmp.lt.u32.totalorder %s492_s8, %s536_s2 }
  0xa3   : > { %p370_p10 = scmp.lt.u32.totalorder %s368_s25, %s364_s22  ;;  %p372_p12 = scmp.lt.u32.totalorder %s364_s22, %s492_s8 }
  0xa4   : > { %p366_p7 = pnand %p365_p4, %p469_p5 }
  0xa5   : > { %p371_p11 = por %p370_p10, %p369_p9 }
  0xa6   : > { %p367_p8 = pneg %p366_p7 }
  0xa7   : > { %p373_p13 = por %p372_p12, %p371_p11 }
  0xa9   : > { %p374_p0 = pnand %p373_p13, %p367_p8 }
  0xab   : > { %377 = shalt.err (!%p374_p0)
}
  0xac   : > { %309 = dma.vmem_to_hbm [thread:$0]  (%p469_p5), %s494_s5, 128, %s492_s8, %s208_s14  }
  0xad PF: > { %p315_p1 = scmp.ge.s32.totalorder %s412_s12, 2  ;;  %s233_s28 = sand.u32 1, %s400_s9  }
  0xae   : > { %s234_s29 = scalar_lea.sflag [#allocation3], %s233_s28 }
  0xaf   : > { %p312_p2 = pnand %p315_p1, %p473_p6 }
  0xb1   : > { %395 = dma.done.wait (!%p312_p2), %s234_s29, 128  }
  0xb2   : > { %397 = vsyncadd (!%p312_p2), %s234_s29, 4294967168  ;;  %p12_p3 = scmp.ge.s32.totalorder %s456_s15, 4   ;;  %s539_s9 = smov %s404_s10 }
  0xb3   : > { %s540_s10 = smov %s408_s11  ;;  %s541_s11 = smov %s467_s18 }
  0xb4   : > { %s542_s12 = smov %s456_s15  ;;  %14 = sbr.rel (!%p12_p3) target bundleno = 3 (0x3), region = 66 }
  0xbb   :  { %239 = vsyncpa [#allocation3], 1 }
  0xbc   :  { %241 = vsyncpa [#allocation3 + $0x1], 1 }

</bundles_post_ra>
